<compile_context>
chip_gen: v5e
topology: v5e:2x2
jax: 0.10.0
libtpu: 0.0.40
codegen_flags: <defaults>
</compile_context>

<pallas_src>
import numpy as np
import jax
import jax.numpy as jnp
from functools import partial
from jax.experimental import pallas as pl
from jax.experimental.pallas import tpu as pltpu

LANE = 128     # lane width of a vreg (last-dim alignment target)
SUBLANE = 8    # sublanes of an f32 vreg (second-to-last-dim alignment target)


def _round_up(n, m):
    return ((n + m - 1) // m) * m


def _fused_mlp_kernel(x_ref, w_ref, b_ref, o_ref):
    """x_ref: (Bp, F) f32, w_ref: (L, F, F) bf16, b_ref: (L, 1, F) f32.

    Statically-unrolled chain of L Linear layers. Each jnp.dot runs on the MXU
    with bf16 operands and an f32 accumulator; the bias add stays f32 on the
    VPU. Intermediates are a single (Bp, F) tile each, so nothing round-trips
    through HBM.
    """
    L = w_ref.shape[0]
    h_bf16 = x_ref[...].astype(jnp.bfloat16)
    acc = None
    for i in range(L):                      # static unroll (L known at trace time)
        w = w_ref[i]                        # (F, F) bf16
        b = b_ref[i]                        # (1, F) f32
        acc = jnp.dot(h_bf16, w, preferred_element_type=jnp.float32) + b
        h_bf16 = acc.astype(jnp.bfloat16)
    o_ref[...] = acc.astype(o_ref.dtype)


def init_nn2_params(key, in_N, width, depth, out_N):
    """Deterministic init mimicking nn.Linear default (U[-1/sqrt(fan_in), +])."""
    dims = [in_N] + [width] * (depth + 1) + [out_N]
    params = []
    for i in range(len(dims) - 1):
        fan_in, fan_out = dims[i], dims[i + 1]
        key, kw, kb = jax.random.split(key, 3)
        bound = 1.0 / float(np.sqrt(fan_in))
        w = jax.random.uniform(kw, (fan_in, fan_out), jnp.float32, -bound, bound)
        b = jax.random.uniform(kb, (fan_out,), jnp.float32, -bound, bound)
        params.append((w, b))
    return params


def pack_params_for_tpu(params, f_pad=LANE):
    """Pack per-layer (W, b) into one (L, f_pad, f_pad) bf16 weight stack and
    one (L, 1, f_pad) f32 bias stack, zero-padded (keeps the affine chain exact)."""
    L = len(params)
    w_stack = jnp.zeros((L, f_pad, f_pad), jnp.bfloat16)
    b_stack = jnp.zeros((L, 1, f_pad), jnp.float32)
    for i, (w, b) in enumerate(params):
        fi, fo = w.shape
        assert fi <= f_pad and fo <= f_pad
        w_stack = w_stack.at[i, :fi, :fo].set(w.astype(jnp.bfloat16))
        b_stack = b_stack.at[i, 0, :fo].set(b)
    return w_stack, b_stack


@partial(jax.jit, static_argnames=("out_N",))
def nn2_forward(x, w_stack, b_stack, out_N):
    """Pad -> single fused pallas_call -> slice, all under one jit."""
    B, in_N = x.shape
    _, f_pad, _ = w_stack.shape
    Bp = _round_up(max(B, SUBLANE), SUBLANE)

    # Zero-pad batch to a sublane multiple and features to the padded width.
    x_p = jnp.zeros((Bp, f_pad), jnp.float32).at[:B, :in_N].set(x)

    y_p = pl.pallas_call(
        _fused_mlp_kernel,
        out_shape=jax.ShapeDtypeStruct((Bp, f_pad), jnp.float32),
        # Whole-array VMEM blocks: total footprint (x + W-stack + b-stack +
        # out) is well under 200 KiB -- far below scoped-VMEM limits on
        # v5e/v6e/v7x -- so no grid is needed at this size.
        in_specs=[pl.BlockSpec(memory_space=pltpu.MemorySpace.VMEM)] * 3,
        out_specs=pl.BlockSpec(memory_space=pltpu.MemorySpace.VMEM),
    )(x_p, w_stack, b_stack)

    # Slice back to the true (B, out_N) inside the jit (no eager follow-up op).
    return y_p[:B, :out_N]


def nn2_forward_ref(x, params):
    """Host-side float64 reference (independent of TPU matmul precision)."""
    h = np.asarray(x, dtype=np.float64)
    for w, b in params:
        h = h @ np.asarray(w, np.float64) + np.asarray(b, np.float64)
    return h


if __name__ == "__main__":
    in_N, width, depth, out_N = 4, 32, 2, 3
    batch = 8

    key = jax.random.PRNGKey(0)
    kx, kp = jax.random.split(key)
    x = jax.random.normal(kx, (batch, in_N), jnp.float32)

    params = init_nn2_params(kp, in_N, width, depth, out_N)
    w_stack, b_stack = pack_params_for_tpu(params)

    y = nn2_forward(x, w_stack, b_stack, out_N)
    jax.block_until_ready(y)

    y_ref = nn2_forward_ref(np.asarray(x), params)
    assert y.shape == (batch, out_N)
    # bf16 MXU operands -> ~1e-3..1e-2 deviation from the f64 reference.
    assert np.allclose(np.asarray(y, np.float64), y_ref, atol=2e-2, rtol=2e-2)

    print("KERNEL_OK")
</pallas_src>

<mosaic_0001>
module attributes {stable_mosaic.version = 11 : i64} {
  func.func @_fused_mlp_kernel(%arg0: memref<8x128xf32, #tpu.memory_space<vmem>>, %arg1: memref<4x128x128xbf16, #tpu.memory_space<vmem>>, %arg2: memref<4x1x128xf32, #tpu.memory_space<vmem>>, %arg3: memref<8x128xf32, #tpu.memory_space<vmem>>) attributes {dimension_semantics = [], scalar_prefetch = 0 : i64, scratch_operands = 0 : i64, tpu.core_type = #tpu.core_type<tc>} {
    %c0 = arith.constant 0 : index
    %c0_0 = arith.constant 0 : index
    %0 = vector.load %arg0[%c0, %c0_0] : memref<8x128xf32, #tpu.memory_space<vmem>>, vector<8x128xf32>
    %1 = arith.truncf %0 : vector<8x128xf32> to vector<8x128xbf16>
    %c0_1 = arith.constant 0 : index
    %c0_2 = arith.constant 0 : index
    %c0_3 = arith.constant 0 : index
    %2 = vector.load %arg1[%c0_1, %c0_2, %c0_3] : memref<4x128x128xbf16, #tpu.memory_space<vmem>>, vector<1x128x128xbf16>
    %3 = vector.shape_cast %2 : vector<1x128x128xbf16> to vector<128x128xbf16>
    %c0_4 = arith.constant 0 : index
    %c0_5 = arith.constant 0 : index
    %c0_6 = arith.constant 0 : index
    %4 = vector.load %arg2[%c0_4, %c0_5, %c0_6] : memref<4x1x128xf32, #tpu.memory_space<vmem>>, vector<1x1x128xf32>
    %5 = vector.shape_cast %4 : vector<1x1x128xf32> to vector<1x128xf32>
    %cst = arith.constant dense<0.000000e+00> : vector<8x128xf32>
    %6 = tpu.matmul %1, %3, %cst {dimension_numbers = #tpu.dot_dimension_numbers<[1], [0], [0], [1], [0, 0, 1, 1], [], []>} : vector<8x128xbf16>, vector<128x128xbf16>, vector<8x128xf32> -> vector<8x128xf32>
    %7 = vector.broadcast %5 : vector<1x128xf32> to vector<8x128xf32>
    %8 = arith.addf %6, %7 : vector<8x128xf32>
    %9 = arith.truncf %8 : vector<8x128xf32> to vector<8x128xbf16>
    %c1 = arith.constant 1 : index
    %c0_7 = arith.constant 0 : index
    %c0_8 = arith.constant 0 : index
    %10 = vector.load %arg1[%c1, %c0_7, %c0_8] : memref<4x128x128xbf16, #tpu.memory_space<vmem>>, vector<1x128x128xbf16>
    %11 = vector.shape_cast %10 : vector<1x128x128xbf16> to vector<128x128xbf16>
    %c1_9 = arith.constant 1 : index
    %c0_10 = arith.constant 0 : index
    %c0_11 = arith.constant 0 : index
    %12 = vector.load %arg2[%c1_9, %c0_10, %c0_11] : memref<4x1x128xf32, #tpu.memory_space<vmem>>, vector<1x1x128xf32>
    %13 = vector.shape_cast %12 : vector<1x1x128xf32> to vector<1x128xf32>
    %cst_12 = arith.constant dense<0.000000e+00> : vector<8x128xf32>
    %14 = tpu.matmul %9, %11, %cst_12 {dimension_numbers = #tpu.dot_dimension_numbers<[1], [0], [0], [1], [0, 0, 1, 1], [], []>} : vector<8x128xbf16>, vector<128x128xbf16>, vector<8x128xf32> -> vector<8x128xf32>
    %15 = vector.broadcast %13 : vector<1x128xf32> to vector<8x128xf32>
    %16 = arith.addf %14, %15 : vector<8x128xf32>
    %17 = arith.truncf %16 : vector<8x128xf32> to vector<8x128xbf16>
    %c2 = arith.constant 2 : index
    %c0_13 = arith.constant 0 : index
    %c0_14 = arith.constant 0 : index
    %18 = vector.load %arg1[%c2, %c0_13, %c0_14] : memref<4x128x128xbf16, #tpu.memory_space<vmem>>, vector<1x128x128xbf16>
    %19 = vector.shape_cast %18 : vector<1x128x128xbf16> to vector<128x128xbf16>
    %c2_15 = arith.constant 2 : index
    %c0_16 = arith.constant 0 : index
    %c0_17 = arith.constant 0 : index
    %20 = vector.load %arg2[%c2_15, %c0_16, %c0_17] : memref<4x1x128xf32, #tpu.memory_space<vmem>>, vector<1x1x128xf32>
    %21 = vector.shape_cast %20 : vector<1x1x128xf32> to vector<1x128xf32>
    %cst_18 = arith.constant dense<0.000000e+00> : vector<8x128xf32>
    %22 = tpu.matmul %17, %19, %cst_18 {dimension_numbers = #tpu.dot_dimension_numbers<[1], [0], [0], [1], [0, 0, 1, 1], [], []>} : vector<8x128xbf16>, vector<128x128xbf16>, vector<8x128xf32> -> vector<8x128xf32>
    %23 = vector.broadcast %21 : vector<1x128xf32> to vector<8x128xf32>
    %24 = arith.addf %22, %23 : vector<8x128xf32>
    %25 = arith.truncf %24 : vector<8x128xf32> to vector<8x128xbf16>
    %c3 = arith.constant 3 : index
    %c0_19 = arith.constant 0 : index
    %c0_20 = arith.constant 0 : index
    %26 = vector.load %arg1[%c3, %c0_19, %c0_20] : memref<4x128x128xbf16, #tpu.memory_space<vmem>>, vector<1x128x128xbf16>
    %27 = vector.shape_cast %26 : vector<1x128x128xbf16> to vector<128x128xbf16>
    %c3_21 = arith.constant 3 : index
    %c0_22 = arith.constant 0 : index
    %c0_23 = arith.constant 0 : index
    %28 = vector.load %arg2[%c3_21, %c0_22, %c0_23] : memref<4x1x128xf32, #tpu.memory_space<vmem>>, vector<1x1x128xf32>
    %29 = vector.shape_cast %28 : vector<1x1x128xf32> to vector<1x128xf32>
    %cst_24 = arith.constant dense<0.000000e+00> : vector<8x128xf32>
    %30 = tpu.matmul %25, %27, %cst_24 {dimension_numbers = #tpu.dot_dimension_numbers<[1], [0], [0], [1], [0, 0, 1, 1], [], []>} : vector<8x128xbf16>, vector<128x128xbf16>, vector<8x128xf32> -> vector<8x128xf32>
    %31 = vector.broadcast %29 : vector<1x128xf32> to vector<8x128xf32>
    %32 = arith.addf %30, %31 : vector<8x128xf32>
    %c0_25 = arith.constant 0 : index
    %c0_26 = arith.constant 0 : index
    %33 = vector.load %arg3[%c0_25, %c0_26] : memref<8x128xf32, #tpu.memory_space<vmem>>, vector<8x128xf32>
    tpu.vector_store %arg3[%c0_25, %c0_26], %32 {strides = array<i32>} : memref<8x128xf32, #tpu.memory_space<vmem>>, vector<8x128xf32>,
    return
  }
}

</mosaic_0001>

<bundles_post_ra>
// kernel: nn2_forward.1
= control target key start
LH: loop header
LB: loop body
LE: loop exit
PB: predicated region body
PF: predicated region fallthrough
CT: control target
= control target key end

     0   :  { %8 = vsyncpa [#allocation3], 0  ;;  %s567_s15 = smov [#allocation2]   ;;  %s568_s17 = smov 64   ;;  %s611_s0 = inlined_call_operand.vmem [shape: f32[8,128], index: 0, kind: input, shape index: {}]   ;;  %s612_s1 = inlined_call_operand.hbm [shape: bf16[4,128,128], index: 1, kind: input, shape index: {}]   ;;  %s613_s2 = inlined_call_operand.vmem [shape: f32[4,1,128], index: 2, kind: input, shape index: {}]   ;;  %s614_s3 = inlined_call_operand.vmem [shape: f32[8,128], index: 3, kind: output, shape index: {}]  }
   0x1   :  { %s15_s14 = sshll.u32 %s612_s1, 4  ;;  %s17_s16 = sshll.u32 %s567_s15, 4  ;;  %s16_s14 = int_to_ptr.hbm [resolvable:$true] %s15_s14  ;;  %s18_s16 = int_to_ptr.vmem [resolvable:$true] %s17_s16 }
   0x2   :  { %s569_s18 = smov 4  }
   0x3   :  { %23 = dma.hbm_to_vmem [thread:$0]  %s16_s14, 4096, %s18_s16, [#allocation3], %s568_s17, %s568_s17, %s569_s18  }
   0x4   :  { %565 = dma.done.wait [#allocation3], 4096  }
   0x5   :  { %566 = vsyncadd [#allocation3], 4294963200  ;;  %v509_v0 = vld [vmem:[#allocation2 + $0x38] sm:$0xff]  ;;  %v508_v1 = vld [vmem:[#allocation2 + $0x30] sm:$0xff] }
   0x6   :  { %100 = vmatpush.bf16.msra.mxu0 %v509_v0  ;;  %v517_v2 = vld [vmem:[#allocation2 + $0x78] sm:$0xff]  ;;  %v507_v3 = vld [vmem:[#allocation2 + $0x28] sm:$0xff]  ;;  %v516_v4 = vld [vmem:[#allocation2 + $0x70] sm:$0xff] }
   0x7   :  { %184 = vmatpush.bf16.msra.mxu1 %v517_v2  ;;  %v515_v5 = vld [vmem:[#allocation2 + $0x68] sm:$0xff]  ;;  %v506_v6 = vld [vmem:[#allocation2 + $0x20] sm:$0xff]  ;;  %v505_v8 = vld [vmem:[#allocation2 + $0x18] sm:$0xff] }
   0x8   :  { %v514_v7 = vld [vmem:[#allocation2 + $0x60] sm:$0xff]  ;;  %v513_v9 = vld [vmem:[#allocation2 + $0x58] sm:$0xff]  ;;  %v504_v10 = vld [vmem:[#allocation2 + $0x10] sm:$0xff] }
   0x9   :  { %v512_v11 = vld [vmem:[#allocation2 + $0x50] sm:$0xff]  ;;  %v503_v12 = vld [vmem:[#allocation2 + $0x8] sm:$0xff]  ;;  %v502_v14 = vld [vmem:[#allocation2] sm:$0xff] }
   0xa   :  { %101 = vmatpush.bf16.msra.mxu0 %v508_v1  ;;  %v511_v13 = vld [vmem:[#allocation2 + $0x48] sm:$0xff]  ;;  %v30_v15 = vld [vmem:[%s611_s0] sm:$0xff]  ;;  %v525_v18 = vld [vmem:[#allocation2 + $0xb8] sm:$0xff] }
   0xb   :  { %185 = vmatpush.bf16.msra.mxu1 %v516_v4  ;;  %v31_v16 = vpack.c.bf16 %v30_v15, %v30_v15  ;;  %v510_v17 = vld [vmem:[#allocation2 + $0x40] sm:$0xff]  ;;  %268 = vmatpush.bf16.msra.mxu2 %v525_v18  ;;  %v524_v19 = vld [vmem:[#allocation2 + $0xb0] sm:$0xff]  ;;  %v523_v20 = vld [vmem:[#allocation2 + $0xa8] sm:$0xff] }
   0xc   :  { %v522_v21 = vld [vmem:[#allocation2 + $0xa0] sm:$0xff]  ;;  %v521_v22 = vld [vmem:[#allocation2 + $0x98] sm:$0xff]  ;;  %v520_v23 = vld [vmem:[#allocation2 + $0x90] sm:$0xff] }
   0xd   :  { %v537_v24 = vld [vmem:[%s613_s2] ss:$0 sm:$0xff]  ;;  %v519_v25 = vld [vmem:[#allocation2 + $0x88] sm:$0xff]  ;;  %v533_v31 = vld [vmem:[#allocation2 + $0xf8] sm:$0xff] }
   0xe   :  { %102 = vmatpush.bf16.msra.mxu0 %v507_v3  ;;  %v518_v30 = vld [vmem:[#allocation2 + $0x80] sm:$0xff]  ;;  %352 = vmatpush.bf16.msra.mxu3 %v533_v31  ;;  %v532_v32 = vld [vmem:[#allocation2 + $0xf0] sm:$0xff]  ;;  %v531_v33 = vld [vmem:[#allocation2 + $0xe8] sm:$0xff] }
   0xf   :  { %186 = vmatpush.bf16.msra.mxu1 %v515_v5  ;;  %269 = vmatpush.bf16.msra.mxu2 %v524_v19  ;;  %v530_v34 = vld [vmem:[#allocation2 + $0xe0] sm:$0xff]  ;;  %v529_v35 = vld [vmem:[#allocation2 + $0xd8] sm:$0xff]  ;;  %v528_v36 = vld [vmem:[#allocation2 + $0xd0] sm:$0xff] }
  0x10   :  { %v538_v37 = vld [vmem:[%s613_s2 + $0x1] ss:$0 sm:$0xff]  ;;  %v527_v38 = vld [vmem:[#allocation2 + $0xc8] sm:$0xff]  ;;  %v539_v44 = vld [vmem:[%s613_s2 + $0x2] ss:$0 sm:$0xff] }
  0x11   :  { %v526_v43 = vld [vmem:[#allocation2 + $0xc0] sm:$0xff] }
  0x12   :  { %103 = vmatpush.bf16.msra.mxu0 %v506_v6  ;;  %353 = vmatpush.bf16.msra.mxu3 %v532_v32  ;;  %v540_v49 = vld [vmem:[%s613_s2 + $0x3] ss:$0 sm:$0xff] }
  0x13   :  { %187 = vmatpush.bf16.msra.mxu1 %v514_v7  ;;  %270 = vmatpush.bf16.msra.mxu2 %v523_v20 }
  0x16   :  { %104 = vmatpush.bf16.msra.mxu0 %v505_v8  ;;  %354 = vmatpush.bf16.msra.mxu3 %v531_v33 }
  0x17   :  { %188 = vmatpush.bf16.msra.mxu1 %v513_v9  ;;  %271 = vmatpush.bf16.msra.mxu2 %v522_v21 }
  0x1a   :  { %105 = vmatpush.bf16.msra.mxu0 %v504_v10  ;;  %355 = vmatpush.bf16.msra.mxu3 %v530_v34 }
  0x1b   :  { %189 = vmatpush.bf16.msra.mxu1 %v512_v11  ;;  %272 = vmatpush.bf16.msra.mxu2 %v521_v22 }
  0x1e   :  { %106 = vmatpush.bf16.msra.mxu0 %v503_v12  ;;  %356 = vmatpush.bf16.msra.mxu3 %v529_v35 }
  0x1f   :  { %190 = vmatpush.bf16.msra.mxu1 %v511_v13  ;;  %273 = vmatpush.bf16.msra.mxu2 %v520_v23 }
  0x22   :  { %107 = vmatpush.bf16.msra.mxu0 %v502_v14  ;;  %357 = vmatpush.bf16.msra.mxu3 %v528_v36 }
  0x23   :  { %191 = vmatpush.bf16.msra.mxu1 %v510_v17  ;;  %274 = vmatpush.bf16.msra.mxu2 %v519_v25 }
  0x25   :  { %108 = vmatmul.bf16.vlgmr.msra.gmra.mxu0 %v31_v16 }
  0x26   :  { %358 = vmatpush.bf16.msra.mxu3 %v527_v38 }
  0x27   :  { %275 = vmatpush.bf16.msra.mxu2 %v518_v30 }
  0x2a   :  { %359 = vmatpush.bf16.msra.mxu3 %v526_v43 }
  0xa2   :  { %v109_v26 = vpop.f32.mrf.mxu0 }
  0xa3   :  { %v110_v27 = vadd.f32 %v537_v24, %v109_v26 }
  0xa5   :  { %v113_v28 = vpack.c.bf16 %v110_v27, %v110_v27 }
  0xa7   :  { %192 = vmatmul.bf16.vlgmr.msra.gmra.mxu1 %v113_v28 }
  0xaa   :  { %v111_v29 = vpop.f32.mrf.mxu0 }
 0x124   :  { %v193_v39 = vpop.f32.mrf.mxu1 }
 0x125   :  { %v194_v40 = vadd.f32 %v538_v37, %v193_v39 }
 0x127   :  { %v197_v41 = vpack.c.bf16 %v194_v40, %v194_v40 }
 0x129   :  { %276 = vmatmul.bf16.vlgmr.msra.gmra.mxu2 %v197_v41 }
 0x12c   :  { %v195_v42 = vpop.f32.mrf.mxu1 }
 0x1ac   :  { %v277_v45 = vpop.f32.mrf.mxu2 }
 0x1ad   :  { %v278_v46 = vadd.f32 %v539_v44, %v277_v45 }
 0x1af   :  { %v281_v47 = vpack.c.bf16 %v278_v46, %v278_v46 }
 0x1b1   :  { %360 = vmatmul.bf16.vlgmr.msra.gmra.mxu3 %v281_v47 }
 0x1b4   :  { %v279_v48 = vpop.f32.mrf.mxu2 }
 0x234   :  { %v361_v50 = vpop.f32.mrf.mxu3 }
 0x235   :  { %v362_v51 = vadd.f32 %v540_v49, %v361_v50 }
 0x237   :  { %365 = vst [vmem:[%s614_s3] sm:$0xff] %v362_v51 }
 0x23c   :  { %v363_v52 = vpop.f32.mrf.mxu3 }
 0x23d   :  { %370 = vsyncpa [#allocation3], 1 }

</bundles_post_ra>
